<compile_context>
chip_gen: v5e
topology: v5e:2x2
jax: 0.10.0
libtpu: 0.0.40
codegen_flags: <defaults>
</compile_context>

<pallas_src>
import jax
import jax.numpy as jnp
from jax.experimental import pallas as pl
from jax.experimental.pallas import tpu as pltpu

LANE = 128
_COL_CANDIDATES = (4096, 2048, 1024, 512, 256, 128)


def _dequant_kernel(scale_ref, offset_ref, x_ref, o_ref):
    # scale_ref / offset_ref: (1,) f32 scalars in SMEM; offset is pre-rounded.
    # Compute in f32 in-vreg, store back in the output dtype.
    x = x_ref[...].astype(jnp.float32)
    o_ref[...] = ((x + offset_ref[0]) * scale_ref[0]).astype(o_ref.dtype)


def _target_block_bytes():
    """Per-input block size target, tuned per TPU generation."""
    try:
        kind = jax.devices()[0].device_kind.lower()
    except Exception:
        kind = ""
    if "v5" in kind:
        # v5e: 2 MiB blocks -> ~8 MiB with in/out double buffering, under the
        # 16 MiB scoped-VMEM default; HBM is slow enough that this amortizes
        # the ~0.35 us/step overhead fine.
        return 2 << 20
    # v6e / v7x: fatter blocks amortize the fixed per-step cost at higher HBM BW.
    return 4 << 20


def _choose_slab(n_elems, itemsize, target_block_bytes):
    """Pick a lane-dense (rows, cols) slab and a fixed block_rows.

    cols: largest of {4096..128} dividing n_elems while keeping rows >= 8
    (full sublane occupancy -> unmasked stores, dense DMA descriptors).
    block_rows: multiple of 8 sized from target_block_bytes; the grid uses
    pl.cdiv so the ragged last block is handled by Pallas.
    Returns None if no lane-dense slab exists (caller falls back to XLA).
    """
    cols = None
    for cand in _COL_CANDIDATES:
        if n_elems % cand == 0 and n_elems // cand >= 8:
            cols = cand
            break
    if cols is None:
        return None
    rows = n_elems // cols

    block_rows = max(8, (target_block_bytes // (cols * itemsize)) // 8 * 8)
    block_rows = min(block_rows, rows)
    # Guarantee >= 2 grid steps when possible so v7x can shard across both TCs.
    if rows >= 16 and block_rows >= rows:
        block_rows = ((rows + 1) // 2 + 7) // 8 * 8
    # block_rows is a multiple of 8 unless it equals the full extent (legal).
    if block_rows != rows and block_rows % 8:
        block_rows = max(8, (block_rows // 8) * 8)
    return rows, cols, block_rows


def autograd_dequantization_forward(x, scale, offset, *, min_pallas_bytes=256 * 1024):
    """Pallas TPU forward of AutogradDequantizationModule:
         out = (x + round(offset)) * scale
    x: any-shape floating array (NCHW in the test). scale/offset: scalars.
    """
    orig_shape = x.shape
    if not jnp.issubdtype(x.dtype, jnp.floating):
        x = x.astype(jnp.float32)
    out_dtype = x.dtype

    # Hoisted scalar work: STE forward (round) done once in the wrapper.
    scale_arr = jnp.asarray(scale, jnp.float32).reshape(1)
    offset_arr = jnp.round(jnp.asarray(offset, jnp.float32)).reshape(1)

    n = x.size
    itemsize = x.dtype.itemsize
    slab = None
    if n * itemsize >= min_pallas_bytes and n % LANE == 0:
        slab = _choose_slab(n, itemsize, _target_block_bytes())

    if slab is None:
        # Small or awkward (non-128-multiple / rows<8) sizes: a single fused
        # XLA elementwise pass beats pallas_call fixed costs and avoids any
        # pad/slice HBM passes.
        y = (x.astype(jnp.float32) + offset_arr[0]) * scale_arr[0]
        return y.astype(out_dtype).reshape(orig_shape)

    rows, cols, block_rows = slab
    x2d = x.reshape(rows, cols)
    block_bytes = block_rows * cols * itemsize
    # in + out, each double-buffered, plus headroom; capped well under v7x's
    # 64 MiB/TC physical VMEM (and under v5e/v6e physical 128 MiB).
    vmem_limit = int(min(48 << 20, max(32 << 20, 6 * block_bytes)))

    out2d = pl.pallas_call(
        _dequant_kernel,
        out_shape=jax.ShapeDtypeStruct((rows, cols), out_dtype),
        grid_spec=pltpu.PrefetchScalarGridSpec(
            num_scalar_prefetch=0,
            grid=(pl.cdiv(rows, block_rows),),
            in_specs=[
                pl.BlockSpec(memory_space=pltpu.SMEM),             # scale
                pl.BlockSpec(memory_space=pltpu.SMEM),             # round(offset)
                pl.BlockSpec((block_rows, cols), lambda i: (i, 0)),
            ],
            out_specs=pl.BlockSpec((block_rows, cols), lambda i: (i, 0)),
        ),
        compiler_params=pltpu.CompilerParams(
            # Fully independent grid axis: shards across both TensorCores on
            # v7x, harmless elsewhere.
            dimension_semantics=("parallel",),
            vmem_limit_bytes=vmem_limit,
        ),
    )(scale_arr, offset_arr, x2d)

    return out2d.reshape(orig_shape)


if __name__ == "__main__":
    key = jax.random.PRNGKey(0)
    k1, k2 = jax.random.split(key)

    # Deterministic parameters (fixture draws offset as an int in [-5,5) -> f32).
    scale = jnp.float32(0.1)
    offset = jnp.float32(3.0)

    # Module-consistent small NCHW activation; force the Pallas path so the
    # kernel itself is exercised even at this tiny size.
    x = jax.random.normal(k1, (2, 4, 16, 16), dtype=jnp.float32)
    out = autograd_dequantization_forward(x, scale, offset, min_pallas_bytes=0)
    out = jax.block_until_ready(out)
    ref = (x + jnp.round(offset)) * scale
    assert out.shape == x.shape and out.dtype == x.dtype
    assert jnp.allclose(out, ref, atol=1e-6, rtol=1e-6)

    # Slightly larger activation: natural Pallas path with a multi-step grid.
    x_big = jax.random.normal(k2, (8, 16, 32, 32), dtype=jnp.float32)
    out_big = jax.block_until_ready(
        autograd_dequantization_forward(x_big, scale, offset))
    ref_big = (x_big + jnp.round(offset)) * scale
    assert jnp.allclose(out_big, ref_big, atol=1e-6, rtol=1e-6)

    # Tiny-input bypass (default threshold) must match numerically.
    out_bypass = jax.block_until_ready(
        autograd_dequantization_forward(x, scale, offset))
    assert jnp.allclose(out_bypass, ref, atol=1e-6, rtol=1e-6)

    print("KERNEL_OK")
</pallas_src>

<mosaic_0001>
module attributes {stable_mosaic.version = 11 : i64} {
  func.func @_dequant_kernel(%arg0: i32, %arg1: memref<1xf32, #tpu.memory_space<smem>>, %arg2: memref<1xf32, #tpu.memory_space<smem>>, %arg3: memref<8x256xf32, #tpu.memory_space<vmem>>, %arg4: memref<8x256xf32, #tpu.memory_space<vmem>>) attributes {dimension_semantics = [#tpu.dimension_semantics<parallel>], iteration_bounds = array<i64: 1>, scalar_prefetch = 0 : i64, scratch_operands = 0 : i64, tpu.core_type = #tpu.core_type<tc>, window_params = [{transform_indices = @transform_0, window_bounds = array<i64: 1>}, {transform_indices = @transform_1, window_bounds = array<i64: 1>}, {transform_indices = @transform_2, window_bounds = array<i64: 8, 256>}, {transform_indices = @transform_3, window_bounds = array<i64: 8, 256>}]} {
    %c0 = arith.constant 0 : index
    %c0_0 = arith.constant 0 : index
    %0 = vector.load %arg3[%c0, %c0_0] : memref<8x256xf32, #tpu.memory_space<vmem>>, vector<8x256xf32>
    %c0_1 = arith.constant 0 : index
    %1 = memref.load %arg2[%c0_1] : memref<1xf32, #tpu.memory_space<smem>>
    %2 = vector.broadcast %1 : f32 to vector<8x256xf32>
    %3 = arith.addf %0, %2 : vector<8x256xf32>
    %c0_2 = arith.constant 0 : index
    %4 = memref.load %arg1[%c0_2] : memref<1xf32, #tpu.memory_space<smem>>
    %5 = vector.broadcast %4 : f32 to vector<8x256xf32>
    %6 = arith.mulf %3, %5 : vector<8x256xf32>
    %c0_3 = arith.constant 0 : index
    %c0_4 = arith.constant 0 : index
    %7 = vector.load %arg4[%c0_3, %c0_4] : memref<8x256xf32, #tpu.memory_space<vmem>>, vector<8x256xf32>
    tpu.vector_store %arg4[%c0_3, %c0_4], %6 {strides = array<i32>} : memref<8x256xf32, #tpu.memory_space<vmem>>, vector<8x256xf32>,
    return
  }
  func.func @transform_0(%arg0: i32) -> i32 {
    %c0_i32 = arith.constant 0 : i32
    %c0_i32_0 = arith.constant 0 : i32
    return %c0_i32 : i32
  }
  func.func @transform_1(%arg0: i32) -> i32 {
    %c0_i32 = arith.constant 0 : i32
    %c0_i32_0 = arith.constant 0 : i32
    return %c0_i32 : i32
  }
  func.func @transform_2(%arg0: i32) -> (i32, i32) {
    %c0_i32 = arith.constant 0 : i32
    %c0_i32_0 = arith.constant 0 : i32
    return %arg0, %c0_i32 : i32, i32
  }
  func.func @transform_3(%arg0: i32) -> (i32, i32) {
    %c0_i32 = arith.constant 0 : i32
    %c0_i32_0 = arith.constant 0 : i32
    return %arg0, %c0_i32 : i32, i32
  }
}

</mosaic_0001>

<bundles_post_ra>
// kernel: tpu_custom_call.1
= control target key start
LH: loop header
LB: loop body
LE: loop exit
PB: predicated region body
PF: predicated region fallthrough
CT: control target
= control target key end

     0   :  { %10 = vsyncpa [#allocation5], 0  ;;  %s148_s0 = inlined_call_operand.<no memory space> [shape: f32[1], index: 0, kind: input, shape index: {}]   ;;  %s149_s1 = inlined_call_operand.<no memory space> [shape: f32[1], index: 1, kind: input, shape index: {}]   ;;  %s150_s2 = inlined_call_operand.hbm [shape: f32[8,256], index: 2, kind: input, shape index: {}]   ;;  %s151_s3 = inlined_call_operand.hbm [shape: f32[8,256], index: 3, kind: output, shape index: {}]  }
   0x1   :  { %11 = vsyncpa [#allocation6], 0  ;;  %s21_s14 = sshll.u32 %s150_s2, 4  ;;  %s114_s15 = smov [#allocation4]   ;;  %s22_s14 = int_to_ptr.hbm [resolvable:$true] %s21_s14 }
   0x2   :  { %s23_s16 = sshll.u32 %s114_s15, 4  ;;  %s24_s16 = int_to_ptr.vmem [resolvable:$true] %s23_s16 }
   0x3   :  { %26 = dma.hbm_to_vmem [thread:$0]  %s22_s14, 256, %s24_s16, [#allocation5]  }
   0x4   :  { %110 = dma.done.wait [#allocation5], 256  }
   0x5   :  { %111 = vsyncadd [#allocation5], 4294967040  ;;  %v34_v0 = vstv %s149_s1  ;;  %v31_v1 = vld [vmem:[#allocation4] sm:$0xff]  ;;  %v38_v2 = vstv %s148_s0  ;;  %v32_v3 = vld [vmem:[#allocation4 + $0x8] sm:$0xff]  ;;  %s115_s2 = smov [#allocation7]   ;;  %s50_s24 = sshll.u32 %s151_s3, 4  ;;  %s51_s24 = int_to_ptr.hbm [resolvable:$true] %s50_s24 }
   0x6   :  { %v35_v4 = vadd.f32 %v34_v0, %v31_v1  ;;  %v36_v5 = vadd.f32 %v34_v0, %v32_v3  ;;  %s48_s21 = sshll.u32 %s115_s2, 4  ;;  %s49_s21 = int_to_ptr.vmem [resolvable:$true] %s48_s21 }
   0x8   :  { %v39_v6 = vmul.f32 %v38_v2, %v35_v4  ;;  %v40_v7 = vmul.f32 %v38_v2, %v36_v5 }
   0xa   :  { %41 = vst [vmem:[#allocation7] sm:$0xff] %v39_v6 }
   0xb   :  { %42 = vst [vmem:[#allocation7 + $0x8] sm:$0xff] %v40_v7 }
   0xc   :  { %53 = dma.vmem_to_hbm [thread:$0]  %s49_s21, 256, %s51_s24, [#allocation6]  }
   0xd   :  { %112 = dma.done.wait [#allocation6], 256  }
   0xe   :  { %113 = vsyncadd [#allocation6], 4294967040 }
   0xf   :  { %58 = vsyncpa [#allocation5], 1 }
  0x10   :  { %59 = vsyncpa [#allocation6], 1 }

</bundles_post_ra>
